<compile_context>
chip_gen: v5e
topology: v5e:2x2
jax: 0.10.0
libtpu: 0.0.40
codegen_flags: <defaults>
</compile_context>

<pallas_src>
import math
from functools import partial

import jax
import jax.numpy as jnp
from jax.experimental import pallas as pl
from jax.experimental.pallas import tpu as pltpu

BN_EPS = 1e-5
LANE = 128
SUB16 = 16                      # bf16 sublane granule
VMEM_LIMIT = 32 * 1024 * 1024   # safe on v5e (128MiB), v6e (128MiB), v7x (64MiB)

# Matmul tile defaults (clamped per call).  v5e note: tk=512 is enough there.
TM_DEFAULT = 256
TN_DEFAULT = 256
TK_DEFAULT = 1024


def _round_up(x, m):
    return (x + m - 1) // m * m


def _cparams(*sem):
    return pltpu.CompilerParams(dimension_semantics=sem,
                                vmem_limit_bytes=VMEM_LIMIT)


# ----------------------------- Pallas kernels -----------------------------

def _matmul_bias_act_kernel(x_ref, w_ref, b_ref, o_ref, acc_ref, *, act):
    # Tiled matmul with f32 VMEM accumulator; BN scale already folded into w,
    # so the epilogue is just bias (+ activation).
    @pl.when(pl.program_id(2) == 0)
    def _init():
        acc_ref[...] = jnp.zeros_like(acc_ref)

    acc_ref[...] += jnp.dot(x_ref[...], w_ref[...],
                            preferred_element_type=jnp.float32)

    @pl.when(pl.program_id(2) == pl.num_programs(2) - 1)
    def _finalize():
        y = acc_ref[...] + b_ref[...]
        if act == "silu":
            y = y * jax.nn.sigmoid(y)
        o_ref[...] = y.astype(o_ref.dtype)


def matmul_bias_act(x, w, bias, act="none", out_dtype=jnp.bfloat16,
                    tm=TM_DEFAULT, tn=TN_DEFAULT, tk=TK_DEFAULT):
    """y = act(x @ w + bias). x bf16, w bf16 (BN folded), bias f32 (1, N)."""
    m, k = x.shape
    k2, n = w.shape
    assert k == k2, (x.shape, w.shape)
    m_al = _round_up(m, SUB16)
    k_al = _round_up(k, LANE)
    n_al = _round_up(n, LANE)
    tm = min(tm, m_al)
    tk = min(tk, k_al)
    tn = min(tn, n_al)
    m_pad = _round_up(m_al, tm)
    k_pad = _round_up(k_al, tk)
    n_pad = _round_up(n_al, tn)

    # These pads are no-ops for the channel-padded feature maps we carry.
    xp = x if (m_pad == m and k_pad == k) else jnp.pad(
        x, ((0, m_pad - m), (0, k_pad - k)))
    wp = w if (k_pad == k and n_pad == n) else jnp.pad(
        w, ((0, k_pad - k), (0, n_pad - n)))
    bp = bias if bias.shape[-1] == n_pad else jnp.pad(
        bias, ((0, 0), (0, n_pad - bias.shape[-1])))

    grid = (m_pad // tm, n_pad // tn, k_pad // tk)
    cost = pl.CostEstimate(
        flops=2 * m_pad * n_pad * k_pad,
        transcendentals=(m_pad * n_pad) if act == "silu" else 0,
        bytes_accessed=2 * (m_pad * k_pad + k_pad * n_pad + m_pad * n_pad))

    out = pl.pallas_call(
        partial(_matmul_bias_act_kernel, act=act),
        out_shape=jax.ShapeDtypeStruct((m_pad, n_pad), out_dtype),
        grid_spec=pltpu.PrefetchScalarGridSpec(
            num_scalar_prefetch=0,
            grid=grid,
            in_specs=[
                pl.BlockSpec((tm, tk), lambda i, j, kk: (i, kk)),
                pl.BlockSpec((tk, tn), lambda i, j, kk: (kk, j)),
                pl.BlockSpec((1, tn), lambda i, j, kk: (0, j)),
            ],
            out_specs=pl.BlockSpec((tm, tn), lambda i, j, kk: (i, j)),
            scratch_shapes=[pltpu.VMEM((tm, tn), jnp.float32)]),
        compiler_params=_cparams("parallel", "parallel", "arbitrary"),
        cost_estimate=cost,
    )(xp, wp, bp)
    if m_pad != m or n_pad != n:
        out = out[:m, :n]
    return out


def _dwconv_kernel(x_ref, w_ref, b_ref, o_ref, *, taps, ho, wo):
    # x_ref: (n_phases, Hq, Wq, Cpad) bf16 halo-padded phase planes of one
    # image; w_ref: (KK, Cpad) f32 taps (BN scale folded); b_ref: (1, Cpad).
    c = x_ref.shape[-1]
    acc = jnp.zeros((ho, wo, c), jnp.float32)
    for t, (pi, oy, ox) in enumerate(taps):
        plane = x_ref[pi, oy:oy + ho]                 # (ho, Wq, C) load
        win = plane[:, ox:ox + wo, :].astype(jnp.float32)
        acc = acc + win * w_ref[t]
    y = acc + b_ref[...]
    y = y * jax.nn.sigmoid(y)                         # SiLU
    o_ref[0] = y.astype(o_ref.dtype)


def depthwise_bn_silu(x, w_taps, bias, kernel=3, stride=1):
    """Depthwise conv (in-kernel 9-tap accumulation, no im2col) + BN + SiLU.

    x: (N, H, W, Cpad) bf16 channel-padded.  w_taps: (KK, Cpad) f32 with the
    BN scale folded in.  bias: (1, Cpad) f32.
    """
    n, h, wd, c = x.shape
    k = kernel
    s = stride
    p = (k - 1) // 2
    xp = jnp.pad(x, ((0, 0), (p, p), (p, p), (0, 0)))          # halo pad
    hp, wp = h + 2 * p, wd + 2 * p
    ho = (hp - k) // s + 1
    wo = (wp - k) // s + 1

    if s == 1:
        hq, wq = hp, wp
        phases = xp[:, None]                                    # (N,1,Hp,Wp,C)
    else:
        hq = -(-hp // s)
        wq = -(-wp // s)
        planes = []
        for pa in range(s):
            for pb in range(s):
                plane = xp[:, pa::s, pb::s, :]
                plane = jnp.pad(plane, ((0, 0),
                                        (0, hq - plane.shape[1]),
                                        (0, wq - plane.shape[2]),
                                        (0, 0)))
                planes.append(plane)
        phases = jnp.stack(planes, axis=1)                      # (N,s*s,Hq,Wq,C)
    nph = s * s
    phases = phases.reshape(n * nph, hq, wq, c)

    taps = []
    for di in range(k):
        for dj in range(k):
            taps.append(((di % s) * s + (dj % s), di // s, dj // s))

    out = pl.pallas_call(
        partial(_dwconv_kernel, taps=tuple(taps), ho=ho, wo=wo),
        out_shape=jax.ShapeDtypeStruct((n, ho, wo, c), jnp.bfloat16),
        grid_spec=pltpu.PrefetchScalarGridSpec(
            num_scalar_prefetch=0,
            grid=(n,),
            in_specs=[
                pl.BlockSpec((nph, hq, wq, c), lambda b: (b, 0, 0, 0)),
                pl.BlockSpec((k * k, c), lambda b: (0, 0)),
                pl.BlockSpec((1, c), lambda b: (0, 0)),
            ],
            out_specs=pl.BlockSpec((1, ho, wo, c), lambda b: (b, 0, 0, 0))),
        compiler_params=_cparams("parallel"),
    )(phases, w_taps, bias)
    return out


def _pool_se_kernel(x_ref, w1_ref, b1_ref, w2_ref, b2_ref, o_ref, acc_ref,
                    *, inv_hw):
    # Global avg-pool (tiled sum over HW) fused with the SE MLP in the
    # finalize: gate = sigmoid(silu(pool @ w1 + b1) @ w2 + b2).
    @pl.when(pl.program_id(1) == 0)
    def _init():
        acc_ref[...] = jnp.zeros_like(acc_ref)

    acc_ref[...] += jnp.sum(x_ref[...].astype(jnp.float32), axis=1)

    @pl.when(pl.program_id(1) == pl.num_programs(1) - 1)
    def _finalize():
        pooled = (acc_ref[...] * inv_hw).astype(jnp.bfloat16)       # (1, C)
        pooled8 = jnp.broadcast_to(pooled, (8, pooled.shape[-1]))   # MXU-friendly M
        h = jnp.dot(pooled8, w1_ref[...],
                    preferred_element_type=jnp.float32) + b1_ref[...]
        h = h * jax.nn.sigmoid(h)
        g = jnp.dot(h.astype(jnp.bfloat16), w2_ref[...],
                    preferred_element_type=jnp.float32) + b2_ref[...]
        o_ref[0] = jax.nn.sigmoid(g)[0:1]


def avgpool_se_gate(x, w1, b1, w2, b2, thw_cap=512):
    """x: (N,H,W,Cpad) bf16 -> SE gate (N, 1, Cpad) f32. One fused kernel."""
    n, h, wd, c = x.shape
    hw = h * wd
    xr = x.reshape(n, hw, c)
    thw = min(thw_cap, _round_up(hw, 8))
    hw_pad = _round_up(hw, thw)
    if hw_pad != hw:
        xr = jnp.pad(xr, ((0, 0), (0, hw_pad - hw), (0, 0)))
    sq = w1.shape[1]
    gate = pl.pallas_call(
        partial(_pool_se_kernel, inv_hw=1.0 / hw),
        out_shape=jax.ShapeDtypeStruct((n, 1, c), jnp.float32),
        grid_spec=pltpu.PrefetchScalarGridSpec(
            num_scalar_prefetch=0,
            grid=(n, hw_pad // thw),
            in_specs=[
                pl.BlockSpec((1, thw, c), lambda b, i: (b, i, 0)),
                pl.BlockSpec((c, sq), lambda b, i: (0, 0)),
                pl.BlockSpec((1, sq), lambda b, i: (0, 0)),
                pl.BlockSpec((sq, c), lambda b, i: (0, 0)),
                pl.BlockSpec((1, c), lambda b, i: (0, 0)),
            ],
            out_specs=pl.BlockSpec((1, 1, c), lambda b, i: (b, 0, 0)),
            scratch_shapes=[pltpu.VMEM((1, c), jnp.float32)]),
        compiler_params=_cparams("parallel", "arbitrary"),
    )(xr, w1, b1, w2, b2)
    return gate


def _pool_fc_kernel(x_ref, w_ref, b_ref, o_ref, acc_ref, *, inv_hw):
    # Final global avg-pool fused with the classifier Linear (kept in f32).
    @pl.when(pl.program_id(1) == 0)
    def _init():
        acc_ref[...] = jnp.zeros_like(acc_ref)

    acc_ref[...] += jnp.sum(x_ref[...].astype(jnp.float32), axis=1)

    @pl.when(pl.program_id(1) == pl.num_programs(1) - 1)
    def _finalize():
        pooled = acc_ref[...] * inv_hw                              # (1, C) f32
        pooled8 = jnp.broadcast_to(pooled, (8, pooled.shape[-1]))
        logits = jnp.dot(pooled8, w_ref[...],
                         preferred_element_type=jnp.float32) + b_ref[...]
        o_ref[0] = logits[0:1]


def avgpool_classifier(x, fc_w, fc_b, thw_cap=512):
    """x: (N,H,W,Cpad) bf16 -> logits (N, 1, NclsPad) f32. One fused kernel."""
    n, h, wd, c = x.shape
    hw = h * wd
    xr = x.reshape(n, hw, c)
    thw = min(thw_cap, _round_up(hw, 8))
    hw_pad = _round_up(hw, thw)
    if hw_pad != hw:
        xr = jnp.pad(xr, ((0, 0), (0, hw_pad - hw), (0, 0)))
    ncls_pad = fc_w.shape[1]
    logits = pl.pallas_call(
        partial(_pool_fc_kernel, inv_hw=1.0 / hw),
        out_shape=jax.ShapeDtypeStruct((n, 1, ncls_pad), jnp.float32),
        grid_spec=pltpu.PrefetchScalarGridSpec(
            num_scalar_prefetch=0,
            grid=(n, hw_pad // thw),
            in_specs=[
                pl.BlockSpec((1, thw, c), lambda b, i: (b, i, 0)),
                pl.BlockSpec((c, ncls_pad), lambda b, i: (0, 0)),
                pl.BlockSpec((1, ncls_pad), lambda b, i: (0, 0)),
            ],
            out_specs=pl.BlockSpec((1, 1, ncls_pad), lambda b, i: (b, 0, 0)),
            scratch_shapes=[pltpu.VMEM((1, c), jnp.float32)]),
        compiler_params=_cparams("parallel", "arbitrary"),
    )(xr, fc_w, fc_b)
    return logits


def _project_kernel(x_ref, g_ref, w_ref, b_ref, *rest, has_res):
    # Fused: SE gating (bf16) * x -> 1x1 project matmul -> bias -> (+ residual).
    if has_res:
        res_ref, o_ref = rest
    else:
        (o_ref,) = rest
    xg = x_ref[0] * g_ref[0].astype(jnp.bfloat16)          # (thw,K) * (1,K) bf16
    y = jnp.dot(xg, w_ref[...], preferred_element_type=jnp.float32)
    y = y + b_ref[...]
    if has_res:
        y = y + res_ref[0].astype(jnp.float32)
    o_ref[0] = y.astype(o_ref.dtype)


def project_conv(x, gate, w, bias, residual=None, thw_cap=256):
    """1x1 project conv with fused SE gating, BN bias and optional residual."""
    n, h, wd, c = x.shape
    k_pad, co_pad = w.shape
    assert k_pad == c
    hw = h * wd
    xr = x.reshape(n, hw, c)
    thw = min(thw_cap, _round_up(hw, 8))
    hw_pad = _round_up(hw, thw)
    if hw_pad != hw:
        xr = jnp.pad(xr, ((0, 0), (0, hw_pad - hw), (0, 0)))

    inputs = [xr, gate, w, bias]
    in_specs = [
        pl.BlockSpec((1, thw, k_pad), lambda b, i: (b, i, 0)),
        pl.BlockSpec((1, 1, k_pad), lambda b, i: (b, 0, 0)),
        pl.BlockSpec((k_pad, co_pad), lambda b, i: (0, 0)),
        pl.BlockSpec((1, co_pad), lambda b, i: (0, 0)),
    ]
    has_res = residual is not None
    if has_res:
        rr = residual.reshape(n, hw, co_pad)
        if hw_pad != hw:
            rr = jnp.pad(rr, ((0, 0), (0, hw_pad - hw), (0, 0)))
        inputs.append(rr)
        in_specs.append(pl.BlockSpec((1, thw, co_pad), lambda b, i: (b, i, 0)))

    out = pl.pallas_call(
        partial(_project_kernel, has_res=has_res),
        out_shape=jax.ShapeDtypeStruct((n, hw_pad, co_pad), jnp.bfloat16),
        grid_spec=pltpu.PrefetchScalarGridSpec(
            num_scalar_prefetch=0,
            grid=(n, hw_pad // thw),
            in_specs=in_specs,
            out_specs=pl.BlockSpec((1, thw, co_pad), lambda b, i: (b, i, 0))),
        compiler_params=_cparams("parallel", "parallel"),
    )(*inputs)
    if hw_pad != hw:
        out = out[:, :hw, :]
    return out.reshape(n, h, wd, co_pad)


# ------------------------------- glue (JAX) --------------------------------

def _im2col_rows(x, kh, kw, stride, pad):
    # Small im2col used ONLY for the 3x3 stem (Cin=8 -> K=72, below one lane).
    if pad:
        x = jnp.pad(x, ((0, 0), (pad, pad), (pad, pad), (0, 0)))
    n, hp, wp, c = x.shape
    ho = (hp - kh) // stride + 1
    wo = (wp - kw) // stride + 1
    taps = []
    for i in range(kh):
        for j in range(kw):
            taps.append(jax.lax.slice(
                x, (0, i, j, 0),
                (n, i + (ho - 1) * stride + 1, j + (wo - 1) * stride + 1, c),
                (1, stride, stride, 1)))
    cols = jnp.stack(taps, axis=3)                        # (N,HO,WO,KK,C)
    return cols.reshape(n * ho * wo, kh * kw * c), ho, wo


def conv1x1_bn_silu(x, w, bias):
    n, h, wd, c = x.shape
    y = matmul_bias_act(x.reshape(n * h * wd, c), w, bias, act="silu")
    return y.reshape(n, h, wd, w.shape[1])


def mbconv(x, blk):
    inp = x
    if blk["expand_w"] is not None:
        x = conv1x1_bn_silu(x, blk["expand_w"], blk["expand_b"])
    x = depthwise_bn_silu(x, blk["dw_w"], blk["dw_b"],
                          kernel=blk["dw_k"], stride=blk["stride"])
    # Squeeze-Excitation: pool + MLP fused in one kernel; gate + residual
    # fused into the project conv.  StochasticDepth is identity in eval mode.
    gate = avgpool_se_gate(x, blk["se_w1"], blk["se_b1"],
                           blk["se_w2"], blk["se_b2"])
    residual = inp if blk["use_res"] else None
    x = project_conv(x, gate, blk["proj_w"], blk["proj_b"], residual=residual)
    return x


def efficientnet_forward(x_nchw, pp):
    x = jnp.transpose(x_nchw, (0, 2, 3, 1)).astype(jnp.bfloat16)   # NCHW -> NHWC
    n = x.shape[0]

    # Stem: 3x3 stride-2 conv + BN (folded) + SiLU.
    xm, ho, wo = _im2col_rows(x, 3, 3, 2, 1)                        # (M, 72)
    xm = jnp.pad(xm, ((0, 0), (0, pp["stem_w"].shape[0] - xm.shape[1])))
    y = matmul_bias_act(xm, pp["stem_w"], pp["stem_b"], act="silu")
    x = y.reshape(n, ho, wo, pp["stem_w"].shape[1])                 # channel-padded

    for blk in pp["blocks"]:
        x = mbconv(x, blk)

    # Head 1x1 conv + BN + SiLU.
    x = conv1x1_bn_silu(x, pp["head_w"], pp["head_b"])

    # AdaptiveAvgPool2d(1) + flatten + Dropout(eval: identity) + Linear,
    # fused into one pool+classifier kernel (kept in f32 for the logits).
    logits = avgpool_classifier(x, pp["fc_w"], pp["fc_b"])
    return logits[:, 0, :pp["num_classes"]]                        # single final slice


# --------------------------- params / prep ---------------------------------

def _make_divisible(v, divisor=8, min_value=None):
    if min_value is None:
        min_value = divisor
    new_v = max(min_value, int(v + divisor / 2) // divisor * divisor)
    if new_v < 0.9 * v:
        new_v += divisor
    return new_v


def adjust_channels(channels, width_mult=1.0):
    return _make_divisible(channels * width_mult, 8)


def _bn_fold(c):
    gamma = jnp.ones((c,), jnp.float32)
    beta = jnp.zeros((c,), jnp.float32)
    mean = jnp.zeros((c,), jnp.float32)
    var = jnp.ones((c,), jnp.float32)
    scale = gamma / jnp.sqrt(var + BN_EPS)
    bias = beta - mean * scale
    return scale, bias


def _kaiming_conv(key, shape, fan_out):
    std = math.sqrt(2.0 / fan_out)
    return std * jax.random.normal(key, shape, dtype=jnp.float32)


def fold_bn_pad(w4, bn):
    """Dense conv weight (kh,kw,cin,cout) -> (Kpad, CoutPad) bf16 with BN scale
    folded; bias -> (1, CoutPad) f32."""
    scale, bias = bn
    kh, kw, cin, cout = w4.shape
    wf = (w4 * scale.reshape(1, 1, 1, -1)).reshape(kh * kw * cin, cout)
    kpad = _round_up(kh * kw * cin, LANE)
    copad = _round_up(cout, LANE)
    wp = jnp.pad(wf, ((0, kpad - kh * kw * cin),
                      (0, copad - cout))).astype(jnp.bfloat16)
    bp = jnp.pad(bias, (0, copad - cout)).reshape(1, copad).astype(jnp.float32)
    return wp, bp


def fold_bn_pad_dw(w3, bn):
    """Depthwise weight (kh,kw,c) -> (KK, Cpad) f32 taps with BN scale folded."""
    scale, bias = bn
    kh, kw, c = w3.shape
    cpad = _round_up(c, LANE)
    wf = (w3 * scale.reshape(1, 1, -1)).reshape(kh * kw, c)
    wp = jnp.pad(wf, ((0, 0), (0, cpad - c))).astype(jnp.float32)
    bp = jnp.pad(bias, (0, cpad - c)).reshape(1, cpad).astype(jnp.float32)
    return wp, bp


def pad_se(w1, b1, w2, b2):
    c, sq = w1.shape
    cpad = _round_up(c, LANE)
    sqpad = _round_up(sq, LANE)
    w1p = jnp.pad(w1, ((0, cpad - c), (0, sqpad - sq))).astype(jnp.bfloat16)
    b1p = jnp.pad(b1, (0, sqpad - sq)).reshape(1, sqpad).astype(jnp.float32)
    w2p = jnp.pad(w2, ((0, sqpad - sq), (0, cpad - c))).astype(jnp.bfloat16)
    b2p = jnp.pad(b2, (0, cpad - c)).reshape(1, cpad).astype(jnp.float32)
    return w1p, b1p, w2p, b2p


def pad_fc(w, b):
    cin, ncls = w.shape
    cpad = _round_up(cin, LANE)
    npad = _round_up(ncls, LANE)
    wp = jnp.pad(w, ((0, cpad - cin), (0, npad - ncls))).astype(jnp.float32)
    bp = jnp.pad(b, (0, npad - ncls)).reshape(1, npad).astype(jnp.float32)
    return wp, bp


def init_params(key, settings, num_input_channels=8, num_classes=10):
    keys = iter(jax.random.split(key, 128))
    params = {}

    c0 = settings[0]["in_ch"]
    params["stem"] = dict(
        w=_kaiming_conv(next(keys), (3, 3, num_input_channels, c0),
                        fan_out=3 * 3 * c0),
        bn=_bn_fold(c0),
    )

    blocks = []
    for cnf in settings:
        for layer_i in range(cnf["layers"]):
            in_ch = cnf["in_ch"] if layer_i == 0 else cnf["out_ch"]
            stride = cnf["stride"] if layer_i == 0 else 1
            out_ch = cnf["out_ch"]
            exp_ch = _make_divisible(in_ch * cnf["expand_ratio"], 8)
            sq_ch = max(1, in_ch // 4)
            k = cnf["kernel"]

            blk = dict(stride=stride, use_res=(stride == 1 and in_ch == out_ch))
            if exp_ch != in_ch:
                blk["expand"] = dict(
                    w=_kaiming_conv(next(keys), (1, 1, in_ch, exp_ch), fan_out=exp_ch),
                    bn=_bn_fold(exp_ch),
                )
            blk["dw"] = dict(
                w=_kaiming_conv(next(keys), (k, k, exp_ch), fan_out=k * k),
                bn=_bn_fold(exp_ch),
            )
            blk["se_w1"] = _kaiming_conv(next(keys), (exp_ch, sq_ch), fan_out=sq_ch)
            blk["se_b1"] = jnp.zeros((sq_ch,), jnp.float32)
            blk["se_w2"] = _kaiming_conv(next(keys), (sq_ch, exp_ch), fan_out=exp_ch)
            blk["se_b2"] = jnp.zeros((exp_ch,), jnp.float32)
            blk["project"] = dict(
                w=_kaiming_conv(next(keys), (1, 1, exp_ch, out_ch), fan_out=out_ch),
                bn=_bn_fold(out_ch),
            )
            blocks.append(blk)
    params["blocks"] = blocks

    c_last_in = settings[-1]["out_ch"]
    c_last = 4 * c_last_in
    params["head"] = dict(
        w=_kaiming_conv(next(keys), (1, 1, c_last_in, c_last), fan_out=c_last),
        bn=_bn_fold(c_last),
    )

    init_range = 1.0 / math.sqrt(num_classes)
    params["fc_w"] = jax.random.uniform(next(keys), (c_last, num_classes),
                                        minval=-init_range, maxval=init_range,
                                        dtype=jnp.float32)
    params["fc_b"] = jnp.zeros((num_classes,), jnp.float32)
    return params


def prepare_params(params, num_classes):
    """Fold BN scale into weights, pad channels to 128, cast to kernel dtypes."""
    pp = {"num_classes": num_classes}
    pp["stem_w"], pp["stem_b"] = fold_bn_pad(params["stem"]["w"],
                                             params["stem"]["bn"])
    blocks = []
    for blk in params["blocks"]:
        b = dict(stride=blk["stride"], use_res=blk["use_res"],
                 dw_k=blk["dw"]["w"].shape[0])
        if "expand" in blk:
            b["expand_w"], b["expand_b"] = fold_bn_pad(blk["expand"]["w"],
                                                       blk["expand"]["bn"])
        else:
            b["expand_w"], b["expand_b"] = None, None
        b["dw_w"], b["dw_b"] = fold_bn_pad_dw(blk["dw"]["w"], blk["dw"]["bn"])
        (b["se_w1"], b["se_b1"],
         b["se_w2"], b["se_b2"]) = pad_se(blk["se_w1"], blk["se_b1"],
                                          blk["se_w2"], blk["se_b2"])
        b["proj_w"], b["proj_b"] = fold_bn_pad(blk["project"]["w"],
                                               blk["project"]["bn"])
        blocks.append(b)
    pp["blocks"] = blocks
    pp["head_w"], pp["head_b"] = fold_bn_pad(params["head"]["w"],
                                             params["head"]["bn"])
    pp["fc_w"], pp["fc_b"] = pad_fc(params["fc_w"], params["fc_b"])
    return pp


# --------------------------------- main ------------------------------------

if __name__ == "__main__":
    key = jax.random.PRNGKey(0)
    kx, kp = jax.random.split(key)

    # Small inverted-residual setting (MBConvConfig semantics, width/depth mult = 1.0)
    settings = [
        dict(expand_ratio=1, kernel=3, stride=1,
             in_ch=adjust_channels(16), out_ch=adjust_channels(16), layers=1),
        dict(expand_ratio=4, kernel=3, stride=2,
             in_ch=adjust_channels(16), out_ch=adjust_channels(24), layers=1),
    ]

    params = init_params(kp, settings, num_input_channels=8, num_classes=10)
    pp = prepare_params(params, num_classes=10)

    # PyTorch-style NCHW input: batch=2, channels=8, spatial=16x16
    x = jax.random.normal(kx, (2, 8, 16, 16), dtype=jnp.float32)

    out = efficientnet_forward(x, pp)
    out = jax.block_until_ready(out)
    assert out.shape == (2, 10), out.shape
    assert bool(jnp.all(jnp.isfinite(out)))
    print("KERNEL_OK")
</pallas_src>

<mosaic_0001>
module attributes {stable_mosaic.version = 11 : i64} {
  func.func @_matmul_bias_act_kernel(%arg0: i32, %arg1: i32, %arg2: i32, %arg3: memref<128x128xbf16, #tpu.memory_space<vmem>>, %arg4: memref<128x128xbf16, #tpu.memory_space<vmem>>, %arg5: memref<1x128xf32, #tpu.memory_space<vmem>>, %arg6: memref<128x128xbf16, #tpu.memory_space<vmem>>, %arg7: memref<128x128xf32, #tpu.memory_space<vmem>>) attributes {dimension_semantics = [#tpu.dimension_semantics<parallel>, #tpu.dimension_semantics<parallel>, #tpu.dimension_semantics<arbitrary>], iteration_bounds = array<i64: 1, 1, 1>, scalar_prefetch = 0 : i64, scratch_operands = 1 : i64, tpu.core_type = #tpu.core_type<tc>, window_params = [{transform_indices = @transform_0, window_bounds = array<i64: 128, 128>}, {transform_indices = @transform_1, window_bounds = array<i64: 128, 128>}, {transform_indices = @transform_2, window_bounds = array<i64: 1, 128>}, {transform_indices = @transform_3, window_bounds = array<i64: 128, 128>}]} {
    %c0_i32 = arith.constant 0 : i32
    %0 = arith.cmpi eq, %arg2, %c0_i32 : i32
    %1 = arith.extui %0 : i1 to i32
    %c0_i32_0 = arith.constant 0 : i32
    %2 = arith.cmpi ne, %1, %c0_i32_0 : i32
    scf.if %2 {
      %cst_10 = arith.constant 0.000000e+00 : f32
      %12 = vector.broadcast %cst_10 : f32 to vector<128x128xf32>
      %c0_11 = arith.constant 0 : index
      %c0_12 = arith.constant 0 : index
      %13 = vector.load %arg7[%c0_11, %c0_12] : memref<128x128xf32, #tpu.memory_space<vmem>>, vector<128x128xf32>
      tpu.vector_store %arg7[%c0_11, %c0_12], %12 {strides = array<i32>} : memref<128x128xf32, #tpu.memory_space<vmem>>, vector<128x128xf32>,
    } else {
    }
    %c0 = arith.constant 0 : index
    %c0_1 = arith.constant 0 : index
    %3 = vector.load %arg7[%c0, %c0_1] : memref<128x128xf32, #tpu.memory_space<vmem>>, vector<128x128xf32>
    %c0_2 = arith.constant 0 : index
    %c0_3 = arith.constant 0 : index
    %4 = vector.load %arg3[%c0_2, %c0_3] : memref<128x128xbf16, #tpu.memory_space<vmem>>, vector<128x128xbf16>
    %c0_4 = arith.constant 0 : index
    %c0_5 = arith.constant 0 : index
    %5 = vector.load %arg4[%c0_4, %c0_5] : memref<128x128xbf16, #tpu.memory_space<vmem>>, vector<128x128xbf16>
    %cst = arith.constant dense<0.000000e+00> : vector<128x128xf32>
    %6 = tpu.matmul %4, %5, %cst {dimension_numbers = #tpu.dot_dimension_numbers<[1], [0], [0], [1], [0, 0, 1, 1], [], []>} : vector<128x128xbf16>, vector<128x128xbf16>, vector<128x128xf32> -> vector<128x128xf32>
    %7 = arith.addf %3, %6 : vector<128x128xf32>
    %c0_6 = arith.constant 0 : index
    %c0_7 = arith.constant 0 : index
    %8 = vector.load %arg7[%c0_6, %c0_7] : memref<128x128xf32, #tpu.memory_space<vmem>>, vector<128x128xf32>
    tpu.vector_store %arg7[%c0_6, %c0_7], %7 {strides = array<i32>} : memref<128x128xf32, #tpu.memory_space<vmem>>, vector<128x128xf32>,
    %c0_i32_8 = arith.constant 0 : i32
    %9 = arith.cmpi eq, %arg2, %c0_i32_8 : i32
    %10 = arith.extui %9 : i1 to i32
    %c0_i32_9 = arith.constant 0 : i32
    %11 = arith.cmpi ne, %10, %c0_i32_9 : i32
    scf.if %11 {
      %c0_10 = arith.constant 0 : index
      %c0_11 = arith.constant 0 : index
      %12 = vector.load %arg7[%c0_10, %c0_11] : memref<128x128xf32, #tpu.memory_space<vmem>>, vector<128x128xf32>
      %c0_12 = arith.constant 0 : index
      %c0_13 = arith.constant 0 : index
      %13 = vector.load %arg5[%c0_12, %c0_13] : memref<1x128xf32, #tpu.memory_space<vmem>>, vector<1x128xf32>
      %14 = vector.broadcast %13 : vector<1x128xf32> to vector<128x128xf32>
      %15 = arith.addf %12, %14 : vector<128x128xf32>
      %16 = arith.negf %15 : vector<128x128xf32>
      %17 = math.exp %16 : vector<128x128xf32>
      %cst_14 = arith.constant 1.000000e+00 : f32
      %18 = vector.broadcast %cst_14 : f32 to vector<128x128xf32>
      %19 = arith.addf %18, %17 : vector<128x128xf32>
      %20 = arith.divf %18, %19 : vector<128x128xf32>
      %21 = arith.mulf %15, %20 : vector<128x128xf32>
      %22 = arith.truncf %21 : vector<128x128xf32> to vector<128x128xbf16>
      %c0_15 = arith.constant 0 : index
      %c0_16 = arith.constant 0 : index
      %23 = vector.load %arg6[%c0_15, %c0_16] : memref<128x128xbf16, #tpu.memory_space<vmem>>, vector<128x128xbf16>
      tpu.vector_store %arg6[%c0_15, %c0_16], %22 {strides = array<i32>} : memref<128x128xbf16, #tpu.memory_space<vmem>>, vector<128x128xbf16>,
    } else {
    }
    return
  }
  func.func @transform_0(%arg0: i32, %arg1: i32, %arg2: i32) -> (i32, i32) {
    %c0_i32 = arith.constant 0 : i32
    return %arg0, %arg2 : i32, i32
  }
  func.func @transform_1(%arg0: i32, %arg1: i32, %arg2: i32) -> (i32, i32) {
    %c0_i32 = arith.constant 0 : i32
    return %arg2, %arg1 : i32, i32
  }
  func.func @transform_2(%arg0: i32, %arg1: i32, %arg2: i32) -> (i32, i32) {
    %c0_i32 = arith.constant 0 : i32
    %c0_i32_0 = arith.constant 0 : i32
    return %c0_i32, %arg1 : i32, i32
  }
  func.func @transform_3(%arg0: i32, %arg1: i32, %arg2: i32) -> (i32, i32) {
    %c0_i32 = arith.constant 0 : i32
    return %arg0, %arg1 : i32, i32
  }
}

</mosaic_0001>

<bundles_post_ra>
// kernel: tpu_custom_call.1
= control target key start
LH: loop header
LB: loop body
LE: loop exit
PB: predicated region body
PF: predicated region fallthrough
CT: control target
= control target key end

     0   :  { %8 = vsyncpa [#allocation4], 0  ;;  %s1475_s0 = inlined_call_operand.hbm [shape: bf16[128,128], index: 0, kind: input, shape index: {}]   ;;  %s1476_s1 = inlined_call_operand.hbm [shape: bf16[128,128], index: 1, kind: input, shape index: {}]   ;;  %s1477_s2 = inlined_call_operand.vmem [shape: f32[1,128], index: 2, kind: input, shape index: {}]   ;;  %s1478_s3 = inlined_call_operand.hbm [shape: bf16[128,128], index: 3, kind: output, shape index: {}]  }
   0x1   :  { %9 = vsyncpa [#allocation7], 0 }
   0x2   :  { %10 = vsyncpa [#allocation5], 0  ;;  %s15_s14 = sshll.u32 %s1475_s0, 4  ;;  %s1018_s15 = smov [#allocation3]   ;;  %s16_s14 = int_to_ptr.hbm [resolvable:$true] %s15_s14 }
   0x3   :  { %s17_s16 = sshll.u32 %s1018_s15, 4  ;;  %s28_s19 = sshll.u32 %s1476_s1, 4  ;;  %s18_s16 = int_to_ptr.vmem [resolvable:$true] %s17_s16  ;;  %s29_s19 = int_to_ptr.hbm [resolvable:$true] %s28_s19 }
   0x4   :  { %s1019_s20 = smov 64   ;;  %s1020_s21 = smov 4  }
   0x5   :  { %23 = dma.hbm_to_vmem [thread:$0]  %s16_s14, 1024, %s18_s16, [#allocation4], %s1019_s20, %s1019_s20, %s1020_s21  }
   0x6   :  { %s1021_s22 = smov [#allocation6]  }
   0x7   :  { %s30_s23 = sshll.u32 %s1021_s22, 4  ;;  %s31_s23 = int_to_ptr.vmem [resolvable:$true] %s30_s23 }
   0x8   :  { %36 = dma.hbm_to_vmem [thread:$0]  %s29_s19, 1024, %s31_s23, [#allocation7], %s1019_s20, %s1019_s20, %s1020_s21  }
   0x9   :  { %1012 = dma.done.wait [#allocation4], 1024  }
   0xa   :  { %1013 = vsyncadd [#allocation4], 4294966272 }
   0xb   :  { %1014 = dma.done.wait [#allocation7], 1024  }
   0xc   :  { %1015 = vsyncadd [#allocation7], 4294966272  ;;  %v798_v0 = vld [vmem:[#allocation6 + $0x38] sm:$0xff]  ;;  %v797_v1 = vld [vmem:[#allocation6 + $0x30] sm:$0xff]  ;;  %s689_s27 = sshll.u32 %s1478_s3, 4  ;;  %s690_s27 = int_to_ptr.hbm [resolvable:$true] %s689_s27 }
   0xd   :  { %211 = vmatpush.bf16.msra.mxu0 %v798_v0  ;;  %846 = vmatpush.bf16.msra.mxu1 %v798_v0  ;;  %v796_v2 = vld [vmem:[#allocation6 + $0x28] sm:$0xff]  ;;  %v795_v3 = vld [vmem:[#allocation6 + $0x20] sm:$0xff]  ;;  %v794_v4 = vld [vmem:[#allocation6 + $0x18] sm:$0xff] }
   0xe   :  { %847 = vmatpush.bf16.msra.mxu2 %v798_v0  ;;  %848 = vmatpush.bf16.msra.mxu3 %v798_v0  ;;  %v793_v5 = vld [vmem:[#allocation6 + $0x10] sm:$0xff]  ;;  %v792_v6 = vld [vmem:[#allocation6 + $0x8] sm:$0xff]  ;;  %v791_v7 = vld [vmem:[#allocation6] sm:$0xff] }
   0xf   :  { %v783_v8 = vld [vmem:[#allocation3] sm:$0xff]  ;;  %v785_v9 = vld [vmem:[#allocation3 + $0x10] sm:$0xff]  ;;  %v784_v12 = vld [vmem:[#allocation3 + $0x8] sm:$0xff] }
  0x10   :  { %v787_v10 = vld [vmem:[#allocation3 + $0x20] sm:$0xff]  ;;  %v789_v11 = vld [vmem:[#allocation3 + $0x30] sm:$0xff]  ;;  %v786_v13 = vld [vmem:[#allocation3 + $0x18] sm:$0xff] }
  0x11   :  { %212 = vmatpush.bf16.msra.mxu0 %v797_v1  ;;  %849 = vmatpush.bf16.msra.mxu1 %v797_v1  ;;  %v788_v14 = vld [vmem:[#allocation3 + $0x28] sm:$0xff]  ;;  %v790_v15 = vld [vmem:[#allocation3 + $0x38] sm:$0xff]  ;;  %v1058_v16 = vld [vmem:[%s1477_s2] ss:$0 sm:$0xff]  ;;  %s1022_s2 = smov [#allocation8]  }
  0x12   :  { %850 = vmatpush.bf16.msra.mxu2 %v797_v1  ;;  %851 = vmatpush.bf16.msra.mxu3 %v797_v1  ;;  %s687_s24 = sshll.u32 %s1022_s2, 4  ;;  %s688_s24 = int_to_ptr.vmem [resolvable:$true] %s687_s24 }
  0x15   :  { %213 = vmatpush.bf16.msra.mxu0 %v796_v2  ;;  %852 = vmatpush.bf16.msra.mxu1 %v796_v2 }
  0x16   :  { %853 = vmatpush.bf16.msra.mxu2 %v796_v2  ;;  %854 = vmatpush.bf16.msra.mxu3 %v796_v2 }
  0x19   :  { %214 = vmatpush.bf16.msra.mxu0 %v795_v3  ;;  %855 = vmatpush.bf16.msra.mxu1 %v795_v3 }
  0x1a   :  { %856 = vmatpush.bf16.msra.mxu2 %v795_v3  ;;  %857 = vmatpush.bf16.msra.mxu3 %v795_v3 }
  0x1d   :  { %215 = vmatpush.bf16.msra.mxu0 %v794_v4  ;;  %858 = vmatpush.bf16.msra.mxu1 %v794_v4 }
  0x1e   :  { %859 = vmatpush.bf16.msra.mxu2 %v794_v4  ;;  %860 = vmatpush.bf16.msra.mxu3 %v794_v4 }
  0x21   :  { %216 = vmatpush.bf16.msra.mxu0 %v793_v5  ;;  %861 = vmatpush.bf16.msra.mxu1 %v793_v5 }
  0x22   :  { %862 = vmatpush.bf16.msra.mxu2 %v793_v5  ;;  %863 = vmatpush.bf16.msra.mxu3 %v793_v5 }
  0x25   :  { %217 = vmatpush.bf16.msra.mxu0 %v792_v6  ;;  %864 = vmatpush.bf16.msra.mxu1 %v792_v6 }
  0x26   :  { %865 = vmatpush.bf16.msra.mxu2 %v792_v6  ;;  %866 = vmatpush.bf16.msra.mxu3 %v792_v6 }
  0x29   :  { %218 = vmatpush.bf16.msra.mxu0 %v791_v7  ;;  %867 = vmatpush.bf16.msra.mxu1 %v791_v7 }
  0x2a   :  { %868 = vmatpush.bf16.msra.mxu2 %v791_v7  ;;  %869 = vmatpush.bf16.msra.mxu3 %v791_v7 }
  0x2c   :  { %219 = vmatmul.bf16.vlgmr.msra.gmra.mxu0 %v783_v8  ;;  %229 = vmatmul.bf16.vlgmr.msra.gmra.mxu1 %v785_v9 }
  0x2d   :  { %239 = vmatmul.bf16.vlgmr.msra.gmra.mxu2 %v787_v10  ;;  %249 = vmatmul.bf16.vlgmr.msra.gmra.mxu3 %v789_v11 }
  0x3c   :  { %224 = vmatmul.bf16.gmra.mxu0 %v784_v12  ;;  %234 = vmatmul.bf16.gmra.mxu1 %v786_v13 }
  0x3d   :  { %244 = vmatmul.bf16.gmra.mxu2 %v788_v14  ;;  %254 = vmatmul.bf16.gmra.mxu3 %v790_v15 }
  0xa9   :  { %v220_v17 = vpop.f32.mrf.mxu0  ;;  %v230_v18 = vpop.f32.mrf.mxu1 }
  0xaa   :  { %v1061_v19 = vadd.f32 %v1058_v16, %v220_v17  ;;  %v1064_v20 = vadd.f32 %v1058_v16, %v230_v18 }
  0xac   :  { %v767_v21 = vmul.f32 -1.442695, %v1061_v19  ;;  %v771_v22 = vmul.f32 -1.442695, %v1064_v20 }
  0xae   :  { %876 = vpow2.f32 %v767_v21 }
  0xaf   :  { %878 = vpow2.f32 %v771_v22 }
  0xb0   :  { %v240_v23 = vpop.f32.mrf.mxu2  ;;  %v250_v24 = vpop.f32.mrf.mxu3 }
  0xb1   :  { %v1069_v25 = vadd.f32 %v1058_v16, %v240_v23  ;;  %v1072_v26 = vadd.f32 %v1058_v16, %v250_v24  ;;  %v222_v27 = vpop.f32.mrf.mxu0  ;;  %v232_v28 = vpop.f32.mrf.mxu1 }
  0xb2   :  { %v1075_v29 = vadd.f32 %v1058_v16, %v222_v27  ;;  %v1078_v30 = vadd.f32 %v1058_v16, %v232_v28 }
  0xb3   :  { %v775_v31 = vmul.f32 -1.442695, %v1069_v25  ;;  %v779_v32 = vmul.f32 -1.442695, %v1072_v26 }
  0xb4   :  { %v877_v33 = vpop.eup %876  ;;  %v768_v36 = vmul.f32 -1.442695, %v1075_v29  ;;  %v772_v38 = vmul.f32 -1.442695, %v1078_v30 }
  0xb5   :  { %v879_v34 = vpop.eup %878  ;;  %v1082_v35 = vadd.f32 1.0, %v877_v33  ;;  %880 = vpow2.f32 %v775_v31 }
  0xb6   :  { %v1085_v37 = vadd.f32 1.0, %v879_v34  ;;  %882 = vpow2.f32 %v779_v32 }
  0xb7   :  { %884 = vrcp.f32 %v1082_v35  ;;  %v404_v51 = vand.u32 2147483647, %v1082_v35  ;;  %v406_v53 = vand.u32 2147483648, %v1082_v35  ;;  %vm400_vm0 = vweird.f32 %v1082_v35 }
  0xb8   :  { %886 = vrcp.f32 %v1085_v37  ;;  %v242_v39 = vpop.f32.mrf.mxu2  ;;  %v252_v40 = vpop.f32.mrf.mxu3  ;;  %vm460_vm1 = vweird.f32 %v1085_v37  ;;  %v464_v61 = vand.u32 2147483647, %v1085_v37  ;;  %v466_v62 = vand.u32 2147483648, %v1085_v37 }
  0xb9   :  { %888 = vpow2.f32 %v768_v36  ;;  %v1091_v41 = vadd.f32 %v1058_v16, %v242_v39  ;;  %v1094_v43 = vadd.f32 %v1058_v16, %v252_v40  ;;  %v225_v56 = vpop.f32.mrf.mxu0  ;;  %v235_v59 = vpop.f32.mrf.mxu1  ;;  %vm1119_vm2 = vcmp.eq.f32.partialorder %v404_v51, 8.507059e+37 }
  0xba   :  { %890 = vpow2.f32 %v772_v38  ;;  %v1128_v3 = vadd.f32 %v1058_v16, %v225_v56  ;;  %v407_v4 = vor.u32 1.1754944e-38, %v406_v53  ;;  %v1132_v6 = vadd.f32 %v1058_v16, %v235_v59 }
  0xbb   :  { %v881_v42 = vpop.eup %880  ;;  %v776_v48 = vmul.f32 -1.442695, %v1091_v41  ;;  %v780_v55 = vmul.f32 -1.442695, %v1094_v43  ;;  %vm1140_vm4 = vcmp.eq.f32.partialorder %v464_v61, 8.507059e+37  ;;  %v467_v11 = vor.u32 1.1754944e-38, %v466_v62 }
  0xbc   :  { %v883_v44 = vpop.eup %882  ;;  %v1096_v45 = vadd.f32 1.0, %v881_v42  ;;  %v769_v17 = vmul.f32 -1.442695, %v1128_v3  ;;  %v773_v28 = vmul.f32 -1.442695, %v1132_v6 }
  0xbd   :  { %v1098_v46 = vpop.eup %884  ;;  %v1100_v47 = vadd.f32 1.0, %v883_v44 }
  0xbe   :  { %v1103_v49 = vpop.eup %886  ;;  %v396_v50 = vmul.f32 %v1098_v46, %v1082_v35  ;;  %892 = vrcp.f32 %v1096_v45  ;;  %vm401_vm3 = vweird.f32 %v1098_v46  ;;  %v526_v9 = vand.u32 2147483648, %v1096_v45 }
  0xbf   :  { %v889_v52 = vpop.eup %888  ;;  %v456_v54 = vmul.f32 %v1103_v49, %v1085_v37  ;;  %894 = vrcp.f32 %v1100_v47  ;;  %v586_v13 = vand.u32 2147483648, %v1100_v47  ;;  %vm461_vm5 = vweird.f32 %v1103_v49  ;;  %vm1155_vm6 = vmor %vm400_vm0, %vm401_vm3 }
  0xc0   :  { %v891_v57 = vpop.eup %890  ;;  %v397_v58 = vsub.f32 1.0, %v396_v50  ;;  %896 = vpow2.f32 %v776_v48  ;;  %v1123_v1 = vadd.f32 1.0, %v889_v52  ;;  %v245_v18 = vpop.f32.mrf.mxu2  ;;  %v524_v24 = vand.u32 2147483647, %v1096_v45  ;;  %vm1175_vm8 = vmor %vm460_vm1, %vm461_vm5 }
  0xc1   :  { %v457_v60 = vsub.f32 1.0, %v456_v54  ;;  %v1125_v2 = vadd.f32 1.0, %v891_v57  ;;  %898 = vpow2.f32 %v780_v55  ;;  %vm520_vm7 = vweird.f32 %v1096_v45 }
  0xc2   :  { %v398_v63 = vmul.f32 %v1098_v46, %v397_v58  ;;  %900 = vrcp.f32 %v1123_v1  ;;  %v1167_v32 = vor.u32 1.1754944e-38, %v526_v9  ;;  %v584_v33 = vand.u32 2147483647, %v1100_v47 }
  0xc3   :  { %v458_v5 = vmul.f32 %v1103_v49, %v457_v60  ;;  %902 = vrcp.f32 %v1125_v2  ;;  %v419_v34 = vand.u32 2147483647, %v1123_v1  ;;  %v1179_v39 = vor.u32 1.1754944e-38, %v586_v13 }
  0xc4   :  { %v1134_v7 = vpop.eup %892  ;;  %v399_v8 = vadd.f32 %v1098_v46, %v398_v63  ;;  %vm415_vm9 = vweird.f32 %v1123_v1  ;;  %v1183_v40 = vadd.f32 %v1058_v16, %v245_v18  ;;  %vm580_vm11 = vweird.f32 %v1100_v47 }
  0xc5   :  { %v516_v12 = vmul.f32 %v1134_v7, %v1096_v45  ;;  %v1147_v14 = vpop.eup %894  ;;  %v459_v15 = vadd.f32 %v1103_v49, %v458_v5  ;;  %vm521_vm10 = vweird.f32 %v1134_v7  ;;  %904 = vpow2.f32 %v769_v17 }
  0xc6   :  { %v897_v21 = vpop.eup %896  ;;  %v576_v27 = vmul.f32 %v1147_v14, %v1100_v47  ;;  %v403_v31 = vsel %vm1155_vm6, %v1098_v46, %v399_v8  ;;  %v421_v51 = vand.u32 2147483648, %v1123_v1  ;;  %vm1197_vm12 = vcmp.eq.f32.partialorder %v419_v34, 8.507059e+37  ;;  %vm1232_vm3 = vmor %vm520_vm7, %vm521_vm10  ;;  %v255_v47 = vpop.f32.mrf.mxu3 }
  0xc7   :  { %v517_v23 = vsub.f32 1.0, %v516_v12  ;;  %v899_v35 = vpop.eup %898  ;;  %v463_v44 = vsel %vm1175_vm8, %v1103_v49, %v459_v15  ;;  %v1190_v37 = vadd.f32 1.0, %v897_v21  ;;  %v408_v46 = vsel %vm1119_vm2, %v407_v4, %v403_v31 }
  0xc8   :  { %v577_v38 = vsub.f32 1.0, %v576_v27  ;;  %v901_v42 = vpop.eup %900  ;;  %v479_v49 = vand.u32 2147483647, %v1125_v2  ;;  %v1203_v54 = vadd.f32 1.0, %v899_v35  ;;  %v468_v55 = vsel %vm1140_vm4, %v467_v11, %v463_v44 }
  0xc9   :  { %v518_v48 = vmul.f32 %v1134_v7, %v517_v23  ;;  %v411_v50 = vmul.f32 %v901_v42, %v1123_v1  ;;  %v903_v52 = vpop.eup %902  ;;  %906 = vrcp.f32 %v1190_v37  ;;  %vm1207_vm13 = vcmp.eq.f32.partialorder %v524_v24, 8.507059e+37 }
  0xca   :  { %v578_v57 = vmul.f32 %v1147_v14, %v577_v38  ;;  %v471_v59 = vmul.f32 %v903_v52, %v1125_v2  ;;  %v635_v60 = vmul.f32 %v408_v46, %v1061_v19  ;;  %vm581_vm14 = vweird.f32 %v1147_v14 }
  0xcb   :  { %v412_v58 = vsub.f32 1.0, %v411_v50  ;;  %vm475_vm15 = vweird.f32 %v1125_v2  ;;  %v481_v61 = vand.u32 2147483648, %v1125_v2  ;;  %v519_v62 = vadd.f32 %v1134_v7, %v518_v48  ;;  %v905_v5 = vpop.eup %904  ;;  %vm1249_vm7 = vmor %vm580_vm11, %vm581_vm14 }
  0xcc   :  { %vm1218_vm0 = vcmp.eq.f32.partialorder %v584_v33, 8.507059e+37  ;;  %vm416_vm1 = vweird.f32 %v901_v42  ;;  %v472_v4 = vsub.f32 1.0, %v471_v59  ;;  %v639_v8 = vmul.f32 %v468_v55, %v1064_v20  ;;  %v247_v59 = vpop.f32.mrf.mxu2 }
  0xcd   :  { %v413_v0 = vmul.f32 %v901_v42, %v412_v58  ;;  %v422_v9 = vor.u32 1.1754944e-38, %v421_v51  ;;  %vm1223_vm2 = vcmp.eq.f32.partialorder %v479_v49, 8.507059e+37  ;;  %908 = vrcp.f32 %v1203_v54  ;;  %vm417_vm5 = vmor %vm415_vm9, %vm416_vm1  ;;  %v237_v49 = vpop.f32.mrf.mxu1 }
  0xce   :  { %v579_v11 = vadd.f32 %v1147_v14, %v578_v57  ;;  %v473_v13 = vmul.f32 %v903_v52, %v472_v4  ;;  %vm476_vm4 = vweird.f32 %v903_v52  ;;  %v482_v15 = vor.u32 1.1754944e-38, %v481_v61 }
  0xcf   :  { %v414_v12 = vadd.f32 %v901_v42, %v413_v0  ;;  %v907_v20 = vpop.eup %906  ;;  %vm535_vm6 = vweird.f32 %v1190_v37  ;;  %v1240_v17 = vadd.f32 1.0, %v905_v5  ;;  %910 = vpow2.f32 %v773_v28  ;;  %vm477_vm8 = vmor %vm475_vm15, %vm476_vm4 }
  0xd0   :  { %v523_v45 = vsel %vm1232_vm3, %v1134_v7, %v519_v62  ;;  %v474_v21 = vadd.f32 %v903_v52, %v473_v13  ;;  %v531_v22 = vmul.f32 %v907_v20, %v1190_v37  ;;  %v539_v7 = vand.u32 2147483647, %v1190_v37 }
  0xd1   :  { %v418_v1 = vsel %vm417_vm5, %v901_v42, %v414_v12  ;;  %v541_v24 = vand.u32 2147483648, %v1190_v37  ;;  %912 = vrcp.f32 %v1240_v17  ;;  %v583_v27 = vsel %vm1249_vm7, %v1147_v14, %v579_v11  ;;  %v257_v12 = vpop.f32.mrf.mxu3 }
  0xd2   :  { %v423_v23 = vsel %vm1197_vm12, %v422_v9, %v418_v1  ;;  %v478_v31 = vsel %vm477_vm8, %v903_v52, %v474_v21  ;;  %v532_v33 = vsub.f32 1.0, %v531_v22  ;;  %v528_v2 = vsel %vm1207_vm13, %v1167_v32, %v523_v45 }
  0xd3   :  { %v636_v28 = vmul.f32 %v423_v23, %v1075_v29  ;;  %v909_v34 = vpop.eup %908  ;;  %v483_v35 = vsel %vm1223_vm2, %v482_v15, %v478_v31  ;;  %vm536_vm9 = vweird.f32 %v907_v20  ;;  %v777_v36 = vmul.f32 -1.442695, %v1183_v40  ;;  %v227_v29 = vpop.f32.mrf.mxu0 }
  0xd4   :  { %v640_v42 = vmul.f32 %v483_v35, %v1078_v30  ;;  %v533_v44 = vmul.f32 %v907_v20, %v532_v33  ;;  %v591_v14 = vmul.f32 %v909_v34, %v1203_v54  ;;  %v588_v48 = vsel %vm1218_vm0, %v1179_v39, %v583_v27  ;;  %vm537_vm11 = vmor %vm535_vm6, %vm536_vm9 }
  0xd5   :  { %v802_v38 = vpack.c.bf16 %v636_v28, %v635_v60  ;;  %v911_v46 = vpop.eup %910  ;;  %vm1276_vm10 = vcmp.eq.f32.partialorder %v539_v7, 8.507059e+37  ;;  %v542_v50 = vor.u32 1.1754944e-38, %v541_v24  ;;  %914 = vpow2.f32 %v777_v36 }
  0xd6   :  { %v812_v51 = vpack.c.bf16 %v640_v42, %v639_v8  ;;  %v534_v52 = vadd.f32 %v907_v20, %v533_v44  ;;  %v592_v53 = vsub.f32 1.0, %v591_v14  ;;  %v1280_v30 = vadd.f32 1.0, %v911_v46 }
  0xd7   :  { %803 = vst [vmem:[#allocation8] sm:$0xff] %v802_v38   ;;  %v1282_v55 = vpop.eup %912  ;;  %v599_v39 = vand.u32 2147483647, %v1203_v54  ;;  %v601_v56 = vand.u32 2147483648, %v1203_v54  ;;  %v1290_v57 = vadd.f32 %v1058_v16, %v255_v47  ;;  %v1293_v58 = vadd.f32 %v1058_v16, %v227_v29 }
  0xd8   :  { %840 = vst [vmem:[#allocation8 + $0x10] sm:$0xff] %v812_v51   ;;  %v538_v60 = vsel %vm537_vm11, %v907_v20, %v534_v52  ;;  %v593_v61 = vmul.f32 %v909_v34, %v592_v53  ;;  %vm596_vm12 = vweird.f32 %v909_v34  ;;  %v426_v62 = vmul.f32 %v1282_v55, %v1240_v17 }
  0xd9   :  { %v643_v37 = vmul.f32 %v528_v2, %v1069_v25  ;;  %v543_v63 = vsel %vm1276_vm10, %v542_v50, %v538_v60  ;;  %916 = vrcp.f32 %v1280_v30  ;;  %v1302_v0 = vadd.f32 %v1058_v16, %v237_v49 }
  0xda   :  { %v644_v4 = vmul.f32 %v543_v63, %v1091_v41  ;;  %v594_v5 = vadd.f32 %v909_v34, %v593_v61  ;;  %vm595_vm13 = vweird.f32 %v1203_v54  ;;  %v1307_v8 = vadd.f32 %v1058_v16, %v247_v59 }
  0xdb   :  { %v915_v9 = vpop.eup %914  ;;  %v647_v19 = vmul.f32 %v588_v48, %v1072_v26  ;;  %vm597_vm14 = vmor %vm595_vm13, %vm596_vm12  ;;  %v602_v25 = vor.u32 1.1754944e-38, %v601_v56  ;;  %v781_v10 = vmul.f32 -1.442695, %v1290_v57  ;;  %v770_v11 = vmul.f32 -1.442695, %v1293_v58 }
  0xdc   :  { %v822_v13 = vpack.c.bf16 %v644_v4, %v643_v37  ;;  %v598_v20 = vsel %vm597_vm14, %v909_v34, %v594_v5  ;;  %vm600_vm15 = vcmp.eq.f32.partialorder %v599_v39, 8.507059e+37  ;;  %v427_v41 = vsub.f32 1.0, %v426_v62 }
  0xdd   :  { %v603_v15 = vsel %vm600_vm15, %v602_v25, %v598_v20  ;;  %v1312_v45 = vadd.f32 1.0, %v915_v9  ;;  %918 = vpow2.f32 %v781_v10  ;;  %v774_v54 = vmul.f32 -1.442695, %v1302_v0 }
  0xde   :  { %842 = vst [vmem:[#allocation8 + $0x20] sm:$0xff] %v822_v13   ;;  %v648_v26 = vmul.f32 %v603_v15, %v1094_v43  ;;  %920 = vpow2.f32 %v770_v11  ;;  %v778_v18 = vmul.f32 -1.442695, %v1307_v8  ;;  %v1318_v1 = vadd.f32 %v1058_v16, %v257_v12 }
  0xdf   :  { %v1320_v21 = vpop.eup %916  ;;  %922 = vrcp.f32 %v1312_v45  ;;  %v428_v7 = vmul.f32 %v1282_v55, %v427_v41  ;;  %vm430_vm0 = vweird.f32 %v1240_v17  ;;  %v434_v16 = vand.u32 2147483647, %v1240_v17 }
  0xe0   :  { %v832_v22 = vpack.c.bf16 %v648_v26, %v647_v19  ;;  %v486_v23 = vmul.f32 %v1320_v21, %v1280_v30  ;;  %924 = vpow2.f32 %v774_v54  ;;  %v782_v43 = vmul.f32 -1.442695, %v1318_v1 }
  0xe1   :  { %926 = vpow2.f32 %v778_v18  ;;  %v429_v33 = vadd.f32 %v1282_v55, %v428_v7  ;;  %vm431_vm1 = vweird.f32 %v1282_v55  ;;  %v436_v34 = vand.u32 2147483648, %v1240_v17 }
  0xe2   :  { %844 = vst [vmem:[#allocation8 + $0x30] sm:$0xff] %v832_v22   ;;  %v487_v47 = vsub.f32 1.0, %v486_v23  ;;  %928 = vpow2.f32 %v782_v43  ;;  %v494_v42 = vand.u32 2147483647, %v1280_v30  ;;  %vm1346_vm2 = vmor %vm430_vm0, %vm431_vm1  ;;  %v496_v29 = vand.u32 2147483648, %v1280_v30 }
  0xe3   :  { %v919_v24 = vpop.eup %918  ;;  %v433_v48 = vsel %vm1346_vm2, %v1282_v55, %v429_v33  ;;  %vm435_vm3 = vcmp.eq.f32.partialorder %v434_v16, 8.507059e+37  ;;  %v437_v32 = vor.u32 1.1754944e-38, %v436_v34  ;;  %v554_v50 = vand.u32 2147483647, %v1312_v45 }
  0xe4   :  { %v921_v27 = vpop.eup %920  ;;  %v1329_v28 = vadd.f32 1.0, %v919_v24  ;;  %v488_v38 = vmul.f32 %v1320_v21, %v487_v47  ;;  %vm490_vm4 = vweird.f32 %v1280_v30  ;;  %v556_v52 = vand.u32 2147483648, %v1312_v45 }
  0xe5   :  { %v1331_v31 = vpop.eup %922  ;;  %v1336_v2 = vadd.f32 1.0, %v921_v27  ;;  %vm491_vm5 = vweird.f32 %v1320_v21  ;;  %vm1362_vm6 = vcmp.eq.f32.partialorder %v494_v42, 8.507059e+37  ;;  %v438_v59 = vsel %vm435_vm3, %v437_v32, %v433_v48 }
  0xe6   :  { %v546_v35 = vmul.f32 %v1331_v31, %v1312_v45  ;;  %930 = vrcp.f32 %v1329_v28  ;;  %v925_v36 = vpop.eup %924  ;;  %v489_v49 = vadd.f32 %v1320_v21, %v488_v38  ;;  %v497_v60 = vor.u32 1.1754944e-38, %v496_v29  ;;  %vm1383_vm9 = vmor %vm490_vm4, %vm491_vm5 }
  0xe7   :  { %932 = vrcp.f32 %v1336_v2  ;;  %v927_v44 = vpop.eup %926  ;;  %v1358_v53 = vadd.f32 1.0, %v925_v36  ;;  %vm550_vm7 = vweird.f32 %v1312_v45  ;;  %vm1372_vm8 = vcmp.eq.f32.partialorder %v554_v50, 8.507059e+37 }
  0xe8   :  { %v547_v46 = vsub.f32 1.0, %v546_v35  ;;  %v929_v51 = vpop.eup %928  ;;  %v1366_v55 = vadd.f32 1.0, %v927_v44  ;;  %vm551_vm10 = vweird.f32 %v1331_v31  ;;  %v557_v9 = vor.u32 1.1754944e-38, %v556_v52 }
  0xe9   :  { %934 = vrcp.f32 %v1358_v53  ;;  %v1379_v63 = vadd.f32 1.0, %v929_v51  ;;  %v493_v25 = vsel %vm1383_vm9, %v1320_v21, %v489_v49  ;;  %v449_v11 = vand.u32 2147483647, %v1336_v2  ;;  %vm1400_vm12 = vmor %vm550_vm7, %vm551_vm10 }
  0xea   :  { %v548_v17 = vmul.f32 %v1331_v31, %v547_v46  ;;  %936 = vrcp.f32 %v1366_v55  ;;  %v451_v30 = vand.u32 2147483648, %v1336_v2  ;;  %v637_v12 = vmul.f32 %v438_v59, %v1128_v3 }
  0xeb   :  { %vm610_vm11 = vweird.f32 %v1329_v28  ;;  %v614_v13 = vand.u32 2147483647, %v1329_v28  ;;  %v616_v15 = vand.u32 2147483648, %v1329_v28  ;;  %vm445_vm13 = vweird.f32 %v1336_v2 }
  0xec   :  { %v1368_v56 = vpop.eup %930  ;;  %v549_v5 = vadd.f32 %v1331_v31, %v548_v17  ;;  %v509_v54 = vand.u32 2147483647, %v1358_v53  ;;  %938 = vrcp.f32 %v1379_v63  ;;  %v498_v26 = vsel %vm1362_vm6, %v497_v60, %v493_v25 }
  0xed   :  { %v933_v61 = vpop.eup %932  ;;  %v606_v37 = vmul.f32 %v1368_v56, %v1329_v28  ;;  %vm1414_vm15 = vcmp.eq.f32.partialorder %v449_v11, 8.507059e+37  ;;  %v452_v7 = vor.u32 1.1754944e-38, %v451_v30  ;;  %vm611_vm0 = vweird.f32 %v1368_v56 }
  0xee   :  { %v441_v19 = vmul.f32 %v933_v61, %v1336_v2  ;;  %v553_v45 = vsel %vm1400_vm12, %v1331_v31, %v549_v5  ;;  %vm446_vm14 = vweird.f32 %v933_v61  ;;  %vm505_vm1 = vweird.f32 %v1358_v53  ;;  %vm1446_vm7 = vmor %vm610_vm11, %vm611_vm0 }
  0xef   :  { %v607_v10 = vsub.f32 1.0, %v606_v37  ;;  %v935_v3 = vpop.eup %934  ;;  %v558_v27 = vsel %vm1372_vm8, %v557_v9, %v553_v45  ;;  %vm447_vm2 = vmor %vm445_vm13, %vm446_vm14  ;;  %vm1426_vm3 = vcmp.eq.f32.partialorder %v509_v54, 8.507059e+37  ;;  %v511_v33 = vand.u32 2147483648, %v1358_v53 }
  0xf0   :  { %v442_v20 = vsub.f32 1.0, %v441_v19  ;;  %v937_v21 = vpop.eup %936  ;;  %v501_v43 = vmul.f32 %v935_v3, %v1358_v53  ;;  %vm1431_vm4 = vcmp.eq.f32.partialorder %v614_v13, 8.507059e+37  ;;  %v569_v38 = vand.u32 2147483647, %v1366_v55 }
  0xf1   :  { %v608_v22 = vmul.f32 %v1368_v56, %v607_v10  ;;  %v561_v47 = vmul.f32 %v937_v21, %v1366_v55  ;;  %v571_v42 = vand.u32 2147483648, %v1366_v55  ;;  %vm506_vm5 = vweird.f32 %v935_v3 }
  0xf2   :  { %v443_v18 = vmul.f32 %v933_v61, %v442_v20  ;;  %v502_v16 = vsub.f32 1.0, %v501_v43  ;;  %v939_v44 = vpop.eup %938  ;;  %vm566_vm6 = vweird.f32 %v937_v21  ;;  %v512_v17 = vor.u32 1.1754944e-38, %v511_v33  ;;  %vm507_vm9 = vmor %vm505_vm1, %vm506_vm5 }
  0xf3   :  { %v562_v36 = vsub.f32 1.0, %v561_v47  ;;  %v609_v2 = vadd.f32 %v1368_v56, %v608_v22  ;;  %v621_v32 = vmul.f32 %v939_v44, %v1379_v63  ;;  %vm565_vm8 = vweird.f32 %v1366_v55 }
  0xf4   :  { %v444_v24 = vadd.f32 %v933_v61, %v443_v18  ;;  %v503_v29 = vmul.f32 %v935_v3, %v502_v16  ;;  %v629_v52 = vand.u32 2147483647, %v1379_v63  ;;  %vm570_vm10 = vcmp.eq.f32.partialorder %v569_v38, 8.507059e+37  ;;  %vm567_vm11 = vmor %vm565_vm8, %vm566_vm6 }
  0xf5   :  { %v563_v48 = vmul.f32 %v937_v21, %v562_v36  ;;  %v622_v39 = vsub.f32 1.0, %v621_v32  ;;  %v613_v28 = vsel %vm1446_vm7, %v1368_v56, %v609_v2  ;;  %v572_v60 = vor.u32 1.1754944e-38, %v571_v42 }
  0xf6   :  { %v448_v35 = vsel %vm447_vm2, %v933_v61, %v444_v24  ;;  %v504_v51 = vadd.f32 %v935_v3, %v503_v29  ;;  %v631_v61 = vand.u32 2147483648, %v1379_v63  ;;  %vm626_vm12 = vweird.f32 %v939_v44 }
  0xf7   :  { %v453_v14 = vsel %vm1414_vm15, %v452_v7, %v448_v35  ;;  %v623_v37 = vmul.f32 %v939_v44, %v622_v39  ;;  %v641_v53 = vmul.f32 %v498_v26, %v1132_v6  ;;  %v617_v4 = vor.u32 1.1754944e-38, %v616_v15 }
  0xf8   :  { %v638_v46 = vmul.f32 %v453_v14, %v1293_v58  ;;  %v564_v58 = vadd.f32 %v937_v21, %v563_v48  ;;  %v508_v59 = vsel %vm507_vm9, %v935_v3, %v504_v51  ;;  %v645_v56 = vmul.f32 %v558_v27, %v1183_v40 }
  0xf9   :  { %v513_v55 = vsel %vm1426_vm3, %v512_v17, %v508_v59  ;;  %v624_v25 = vadd.f32 %v939_v44, %v623_v37  ;;  %vm625_vm13 = vweird.f32 %v1379_v63  ;;  %v618_v10 = vsel %vm1431_vm4, %v617_v4, %v613_v28 }
  0xfa   :  { %v807_v49 = vpack.c.bf16 %v638_v46, %v637_v12  ;;  %v568_v62 = vsel %vm567_vm11, %v937_v21, %v564_v58  ;;  %v642_v5 = vmul.f32 %v513_v55, %v1302_v0  ;;  %vm627_vm14 = vmor %vm625_vm13, %vm626_vm12  ;;  %v632_v30 = vor.u32 1.1754944e-38, %v631_v61 }
  0xfb   :  { %v573_v9 = vsel %vm570_vm10, %v572_v60, %v568_v62  ;;  %v628_v13 = vsel %vm627_vm14, %v939_v44, %v624_v25  ;;  %vm630_vm15 = vcmp.eq.f32.partialorder %v629_v52, 8.507059e+37  ;;  %v649_v40 = vmul.f32 %v618_v10, %v1290_v57 }
  0xfc   :  { %839 = vst [vmem:[#allocation8 + $0x8] sm:$0xff] %v807_v49   ;;  %v646_v19 = vmul.f32 %v573_v9, %v1307_v8  ;;  %v817_v11 = vpack.c.bf16 %v642_v5, %v641_v53  ;;  %v633_v6 = vsel %vm630_vm15, %v632_v30, %v628_v13 }
  0xfd   :  { %v650_v0 = vmul.f32 %v633_v6, %v1318_v1 }
  0xfe   :  { %v827_v12 = vpack.c.bf16 %v646_v19, %v645_v56  ;;  %841 = vst [vmem:[#allocation8 + $0x18] sm:$0xff] %v817_v11  }
  0xff   :  { %v837_v8 = vpack.c.bf16 %v650_v0, %v649_v40 }
 0x100   :  { %843 = vst [vmem:[#allocation8 + $0x28] sm:$0xff] %v827_v12  }
 0x101   :  { %845 = vst [vmem:[#allocation8 + $0x38] sm:$0xff] %v837_v8  }
 0x102   :  { %695 = dma.vmem_to_hbm [thread:$0]  %s688_s24, 1024, %s690_s27, [#allocation5], %s1019_s20, %s1019_s20, %s1020_s21  }
 0x103   :  { %1016 = dma.done.wait [#allocation5], 1024  }
 0x104   :  { %1017 = vsyncadd [#allocation5], 4294966272 }
 0x105   :  { %700 = vsyncpa [#allocation4], 1 }
 0x106   :  { %701 = vsyncpa [#allocation7], 1 }
 0x107   :  { %702 = vsyncpa [#allocation5], 1 }

</bundles_post_ra>
